<compile_context>
chip_gen: v7x
topology: tpu7x:2x2x1
jax: 0.10.0
libtpu: 0.0.40
codegen_flags: <defaults>
</compile_context>

<pallas_src>
import functools

import jax
import jax.numpy as jnp
from jax.experimental import pallas as pl
from jax.experimental.pallas import tpu as pltpu


def _rmsnorm_kernel(x_ref, w_ref, o_ref, *, eps):
    input_dtype = x_ref.dtype
    x = x_ref[...].astype(jnp.float32)                      # (tm, H) fp32
    variance = jnp.mean(x * x, axis=-1, keepdims=True)      # (tm, 1)
    inv = jax.lax.rsqrt(variance + eps)                     # EUP rsqrt
    normed = (x * inv).astype(input_dtype)                  # cast back like PyTorch
    o_ref[...] = (w_ref[...] * normed).astype(o_ref.dtype)  # weight broadcast over rows


def _round_up(x, m):
    return ((x + m - 1) // m) * m


def _physical_vmem_bytes():
    """Physical VMEM per TensorCore, with a generation-aware fallback."""
    try:
        info = pltpu.get_tpu_info()
        cap = getattr(info, "vmem_capacity_bytes", None)
        if cap:
            return int(cap)
    except Exception:
        pass
    try:
        kind = jax.devices()[0].device_kind.lower()
        if any(g in kind for g in ("v4", "v5", "v6")):
            return 128 * 1024 * 1024      # v4/v5e/v6e: 128 MiB per TC
    except Exception:
        pass
    return 64 * 1024 * 1024               # v7x / unknown: conservative 64 MiB


def _pick_row_tile(rows, hidden, in_bytes, out_bytes, vmem_bytes, in_buffers,
                   target_block_bytes=6 << 20, min_block_bytes=2 << 20,
                   target_steps=8):
    """Byte-targeted, VMEM-bounded, grid-step-aware row tile (8-aligned)."""
    row_bytes_in = max(hidden * in_bytes, 1)
    # (a) aim for ~4-8 MB input blocks (measured HBM-roofline sweet spot).
    cap = max(8, (target_block_bytes // row_bytes_in) // 8 * 8)
    # (b) pipeline working set must fit a conservative fraction of VMEM:
    #     N-buffered input + double-buffered output + ~2 fp32 temporaries.
    budget = int(0.4 * vmem_bytes)
    per_row = hidden * (in_buffers * in_bytes + 2 * out_bytes + 8)
    cap = min(cap, max(8, (budget // max(per_row, 1)) // 8 * 8))
    # (c) keep >= target_steps grid steps (>= ~4 per TC on v7x) when the tensor
    #     is big enough, as long as each block stays >= ~min_block_bytes
    #     (per-step overhead is only ~0.35 us, so extra steps are cheap).
    rows8 = _round_up(rows, 8)
    per_step = _round_up(pl.cdiv(rows8, target_steps), 8)
    min_rows = max(8, (min_block_bytes // row_bytes_in) // 8 * 8)
    cap = min(cap, max(per_step, min_rows))
    return max(8, min(cap, rows8))


def llama_rms_norm(hidden_states, weight, eps=1e-6, *, row_tile=None,
                   output_dtype=None, input_buffers=2):
    """hidden_states: (..., H); weight: (H,).

    output_dtype=None reproduces PyTorch's `weight * x.to(input_dtype)`
    promotion exactly; pass e.g. hidden_states.dtype to keep the output in the
    activation dtype (halves output HBM traffic for bf16 act + fp32 weight).
    """
    orig_shape = hidden_states.shape
    H = orig_shape[-1]
    x2d = hidden_states.reshape(-1, H)
    R = x2d.shape[0]

    if output_dtype is None:
        out_dtype = jnp.promote_types(weight.dtype, hidden_states.dtype)
    else:
        out_dtype = jnp.dtype(output_dtype)
    in_bytes = jnp.dtype(hidden_states.dtype).itemsize
    out_bytes = jnp.dtype(out_dtype).itemsize
    w_bytes = jnp.dtype(weight.dtype).itemsize

    vmem_bytes = _physical_vmem_bytes()
    input_buffers = max(2, int(input_buffers))
    if row_tile is None:
        row_tile = _pick_row_tile(R, H, in_bytes, out_bytes, vmem_bytes,
                                  input_buffers)
    # Row tile must be 8-aligned (sublane); the ARRAY row count R need not be —
    # Pallas masks the partial edge block, so no pad / slice round trip.
    row_tile = max(8, min(_round_up(row_tile, 8), _round_up(R, 8)))

    grid = (pl.cdiv(R, row_tile),)

    w2d = weight.reshape(1, H)

    # Raise the scoped-VMEM limit enough for the pipeline (v5e default is only
    # 16 MiB, v6e/v7x 32 MiB), capped safely below physical VMEM.
    needed = (input_buffers * row_tile * H * in_bytes   # N-buffered input blocks
              + 2 * row_tile * H * out_bytes            # double-buffered output
              + 2 * H * w_bytes                         # resident weight block
              + 2 * row_tile * H * 4                    # fp32 working temporaries
              + (2 << 20))                              # slack
    vmem_limit = max(min(needed, int(0.85 * vmem_bytes)), 32 << 20)

    cost = pl.CostEstimate(
        flops=4 * R * H,                       # square + reduce + scale + weight
        transcendentals=R,                     # one rsqrt per row
        bytes_accessed=R * H * (in_bytes + out_bytes) + H * w_bytes,
    )

    x_spec_kwargs = {}
    if input_buffers > 2:
        x_spec_kwargs["pipeline_mode"] = pl.Buffered(input_buffers)

    out = pl.pallas_call(
        functools.partial(_rmsnorm_kernel, eps=eps),
        out_shape=jax.ShapeDtypeStruct((R, H), out_dtype),
        grid_spec=pltpu.PrefetchScalarGridSpec(
            num_scalar_prefetch=0,
            grid=grid,
            in_specs=[
                pl.BlockSpec((row_tile, H), lambda i: (i, 0), **x_spec_kwargs),
                pl.BlockSpec((1, H), lambda i: (0, 0)),   # constant index -> resident
            ],
            out_specs=pl.BlockSpec((row_tile, H), lambda i: (i, 0)),
        ),
        compiler_params=pltpu.CompilerParams(
            dimension_semantics=("parallel",),
            vmem_limit_bytes=int(vmem_limit),
        ),
        cost_estimate=cost,
    )(x2d, w2d)

    return out.reshape(orig_shape[:-1] + (H,))


def _reference(hidden_states, weight, eps=1e-6):
    input_dtype = hidden_states.dtype
    x = hidden_states.astype(jnp.float32)
    variance = jnp.mean(x * x, axis=-1, keepdims=True)
    x = x * jax.lax.rsqrt(variance + eps)
    return weight * x.astype(input_dtype)


if __name__ == "__main__":
    key = jax.random.PRNGKey(0)

    # --- Test 1: fp32, module-like small shape (B=2, S=8, H=32) -------------
    batch, seq, hidden = 2, 8, 32
    x = jax.random.normal(key, (batch, seq, hidden), dtype=jnp.float32)
    weight = jnp.ones((hidden,), dtype=jnp.float32)   # LlamaRMSNorm inits to ones

    out = llama_rms_norm(x, weight, eps=1e-6)
    jax.block_until_ready(out)
    ref = _reference(x, weight, eps=1e-6)
    assert out.shape == ref.shape and out.dtype == ref.dtype
    assert jnp.allclose(out, ref, atol=1e-5, rtol=1e-5)

    # --- Test 2: multi-step grid + partial edge block (R=37 not % 8) --------
    k2 = jax.random.PRNGKey(0)
    x_edge = jax.random.normal(k2, (37, 256), dtype=jnp.float32)
    w_edge = (1.0 + 0.01 * jnp.arange(256, dtype=jnp.float32))
    out_edge = llama_rms_norm(x_edge, w_edge, eps=1e-6, row_tile=8)  # grid=5, last block partial
    jax.block_until_ready(out_edge)
    ref_edge = _reference(x_edge, w_edge, eps=1e-6)
    assert out_edge.shape == ref_edge.shape and out_edge.dtype == ref_edge.dtype
    assert jnp.allclose(out_edge, ref_edge, atol=1e-5, rtol=1e-5)

    # --- Test 3: bf16 activations + fp32 weight (PyTorch promotion path) ----
    x_bf16 = x.astype(jnp.bfloat16)
    out_bf16 = llama_rms_norm(x_bf16, weight, eps=1e-6)
    jax.block_until_ready(out_bf16)
    ref_bf16 = _reference(x_bf16, weight, eps=1e-6)
    assert out_bf16.shape == ref_bf16.shape and out_bf16.dtype == ref_bf16.dtype
    assert jnp.allclose(out_bf16, ref_bf16, atol=2e-2, rtol=2e-2)

    # --- Test 4: bandwidth-saving output_dtype override (bf16 out) ----------
    out_bf16_narrow = llama_rms_norm(x_bf16, weight, eps=1e-6,
                                     output_dtype=jnp.bfloat16)
    jax.block_until_ready(out_bf16_narrow)
    assert out_bf16_narrow.dtype == jnp.bfloat16
    assert jnp.allclose(out_bf16_narrow.astype(jnp.float32),
                        ref_bf16.astype(jnp.float32), atol=3e-2, rtol=3e-2)

    print("KERNEL_OK")
</pallas_src>

<mosaic_0001>
module attributes {stable_mosaic.version = 11 : i64} {
  func.func @_rmsnorm_kernel(%arg0: i32, %arg1: memref<16x32xf32, #tpu.memory_space<vmem>>, %arg2: memref<1x32xf32, #tpu.memory_space<vmem>>, %arg3: memref<16x32xf32, #tpu.memory_space<vmem>>) attributes {dimension_semantics = [#tpu.dimension_semantics<parallel>], iteration_bounds = array<i64: 1>, scalar_prefetch = 0 : i64, scratch_operands = 0 : i64, tpu.core_type = #tpu.core_type<tc>, window_params = [{transform_indices = @transform_0, window_bounds = array<i64: 16, 32>}, {pipeline_mode = #tpu.pipeline_mode<synchronous>, transform_indices = @transform_1, window_bounds = array<i64: 1, 32>}, {transform_indices = @transform_2, window_bounds = array<i64: 16, 32>}]} {
    %c0 = arith.constant 0 : index
    %c0_0 = arith.constant 0 : index
    %0 = vector.load %arg1[%c0, %c0_0] : memref<16x32xf32, #tpu.memory_space<vmem>>, vector<16x32xf32>
    %1 = arith.mulf %0, %0 : vector<16x32xf32>
    %cst = arith.constant dense<0.000000e+00> : vector<16xf32>
    %2 = vector.multi_reduction <add>, %1, %cst [1] : vector<16x32xf32> to vector<16xf32>
    %3 = vector.shape_cast %2 : vector<16xf32> to vector<16x1xf32>
    %cst_1 = arith.constant 3.200000e+01 : f32
    %4 = vector.broadcast %cst_1 : f32 to vector<16x1xf32>
    %5 = arith.divf %3, %4 : vector<16x1xf32>
    %cst_2 = arith.constant 9.99999997E-7 : f32
    %6 = vector.broadcast %cst_2 : f32 to vector<16x1xf32>
    %7 = arith.addf %5, %6 : vector<16x1xf32>
    %8 = math.rsqrt %7 : vector<16x1xf32>
    %9 = vector.broadcast %8 : vector<16x1xf32> to vector<16x32xf32>
    %10 = arith.mulf %0, %9 : vector<16x32xf32>
    %c0_3 = arith.constant 0 : index
    %c0_4 = arith.constant 0 : index
    %11 = vector.load %arg2[%c0_3, %c0_4] : memref<1x32xf32, #tpu.memory_space<vmem>>, vector<1x32xf32>
    %12 = vector.broadcast %11 : vector<1x32xf32> to vector<16x32xf32>
    %13 = arith.mulf %12, %10 : vector<16x32xf32>
    %c0_5 = arith.constant 0 : index
    %c0_6 = arith.constant 0 : index
    %14 = vector.load %arg3[%c0_5, %c0_6] : memref<16x32xf32, #tpu.memory_space<vmem>>, vector<16x32xf32>
    tpu.vector_store %arg3[%c0_5, %c0_6], %13 {strides = array<i32>} : memref<16x32xf32, #tpu.memory_space<vmem>>, vector<16x32xf32>,
    return
  }
  func.func @transform_0(%arg0: i32) -> (i32, i32) {
    %c0_i32 = arith.constant 0 : i32
    %c0_i32_0 = arith.constant 0 : i32
    return %arg0, %c0_i32 : i32, i32
  }
  func.func @transform_1(%arg0: i32) -> (i32, i32) {
    %c0_i32 = arith.constant 0 : i32
    %c0_i32_0 = arith.constant 0 : i32
    %c0_i32_1 = arith.constant 0 : i32
    return %c0_i32, %c0_i32_0 : i32, i32
  }
  func.func @transform_2(%arg0: i32) -> (i32, i32) {
    %c0_i32 = arith.constant 0 : i32
    %c0_i32_0 = arith.constant 0 : i32
    return %arg0, %c0_i32 : i32, i32
  }
}

</mosaic_0001>

<bundles_post_ra>
// kernel: tpu_custom_call.1
= control target key start
LH: loop header
LB: loop body
LE: loop exit
PB: predicated region body
PF: predicated region fallthrough
CT: control target
= control target key end

     0   :  { %7 = vsyncpa [#allocation3], 0  ;;  %s187_s0 = inlined_call_operand.hbm [shape: f32[16,32], index: 0, kind: input, shape index: {}]   ;;  %s188_s1 = inlined_call_operand.vmem [shape: f32[1,32], index: 1, kind: input, shape index: {}]   ;;  %s189_s2 = inlined_call_operand.hbm [shape: f32[16,32], index: 2, kind: output, shape index: {}]  }
   0x1   :  { %8 = vsyncpa [#allocation4], 0  ;;  %s131_s9 = smov [#allocation2]   ;;  %s83_s13 = scalar_lea.hbm %s187_s0, 256 }
   0x2   :  { %s14_s10 = sshll.u32 %s131_s9, 4  ;;  %p84_p0 = scmp.ne.s32.totalorder %s187_s0, %s83_s13  ;;  %s15_s10 = int_to_ptr.vmem [resolvable:$true] %s14_s10 }
   0x3   :  { %p87_p1 = scmp.lt.u32.totalorder %s83_s13, %s187_s0 }
   0x5   :  { %p89_p2 = pnand %p87_p1, %p84_p0 }
   0x7   :  { %92 = shalt.err (!%p89_p2)
}
   0x8   :  { %s93_s18 = scalar_lea.vmem %s15_s10, 256  ;;  %p98_p4 = scmp.lt.s32.totalorder %s15_s10, %s15_s10 }
   0x9   :  { %p94_p3 = scmp.ne.s32.totalorder %s15_s10, %s93_s18  ;;  %p99_p5 = scmp.lt.s32.totalorder %s93_s18, %s93_s18 }
   0xb   :  { %p100_p6 = por %p99_p5, %p98_p4 }
   0xd   :  { %p101_p7 = pnand %p100_p6, %p94_p3 }
   0xf   :  { %104 = shalt.err (!%p101_p7)
}
  0x10   :  { %s132_s19 = smov 128   ;;  %s133_s20 = smov 8  }
  0x11   :  { %20 = dma.hbm_to_vmem [thread:$0]  %s187_s0, 256, %s15_s10, [#allocation3], %s132_s19, %s132_s19, %s133_s20  }
  0x12   :  { %127 = dma.done.wait [#allocation3], 256  }
  0x13   :  { %128 = vsyncadd [#allocation3], 4294967040  ;;  %v26_v0 = vld [vmem:[#allocation2] sm:$0xff]  ;;  %vm30_vm0 = vcmask 261120   ;;  %v27_v1 = vld [vmem:[#allocation2 + $0x8] sm:$0xff]  ;;  %s134_s24 = smov [#allocation5]  }
  0x14   :  { %v28_v2 = vmul.f32 %v26_v0, %v26_v0  ;;  %v29_v3 = vmul.f32 %v27_v1, %v27_v1  ;;  %v74_v13 = vld [vmem:[%s188_s1] ss:$0 sm:$0xff]  ;;  %s62_s25 = sshll.u32 %s134_s24, 4  ;;  %s63_s25 = int_to_ptr.vmem [resolvable:$true] %s62_s25 }
  0x15   :  { %s105_s26 = scalar_lea.vmem %s63_s25, 256  ;;  %p110_p9 = scmp.lt.s32.totalorder %s63_s25, %s63_s25 }
  0x16   :  { %v31_v4 = vsel %vm30_vm0, %v28_v2, 0.0  ;;  %v34_v5 = vsel %vm30_vm0, %v29_v3, 0.0  ;;  %p106_p8 = scmp.ne.s32.totalorder %s63_s25, %s105_s26  ;;  %p111_p10 = scmp.lt.s32.totalorder %s105_s26, %s105_s26 }
  0x17   :  { %32 = vadd.xlane.f32.xlu0 %v31_v4 }
  0x18   :  { %p112_p11 = por %p111_p10, %p110_p9 }
  0x1a   :  { %p113_p12 = pnand %p112_p11, %p106_p8 }
  0x1b   :  { %35 = vadd.xlane.f32.xlu0 %v34_v5 }
  0xa4   :  { %v33_v6 = vpop.xlane.xlu0 %32 }
  0xa5   :  { %v38_v7 = vmul.f32 0.03125, %v33_v6 }
  0xa7   :  { %v40_v8 = vadd.f32 1e-06, %v38_v7 }
  0xa8   :  { %v36_v9 = vpop.xlane.xlu0 %35 }
  0xa9   :  { %79 = vrsqrt.f32 %v40_v8  ;;  %v39_v10 = vmul.f32 0.03125, %v36_v9 }
  0xab   :  { %v41_v11 = vadd.f32 1e-06, %v39_v10 }
  0xad   :  { %81 = vrsqrt.f32 %v41_v11 }
  0xb3   :  { %v80_v12 = vpop.eup %79 }
  0xb4   :  { %v44_v14 = vmul.f32 %v80_v12, %v26_v0 }
  0xb6   :  { %v53_v15 = vmul.f32 %v74_v13, %v44_v14 }
  0xb7   :  { %v82_v16 = vpop.eup %81 }
  0xb8   :  { %v45_v17 = vmul.f32 %v82_v16, %v27_v1  ;;  %55 = vst.msk [vmem:[#allocation5] sm:$0xff] %vm30_vm0, %v53_v15 }
  0xba   :  { %v54_v18 = vmul.f32 %v74_v13, %v45_v17 }
  0xbc   :  { %56 = vst.msk [vmem:[#allocation5 + $0x8] sm:$0xff] %vm30_vm0, %v54_v18 }
  0xbd   :  { %116 = shalt.err (!%p113_p12)
}
  0xbe   :  { %s117_s28 = scalar_lea.hbm %s189_s2, 256 }
  0xbf   :  { %p118_p13 = scmp.ne.s32.totalorder %s189_s2, %s117_s28  ;;  %p121_p0 = scmp.lt.u32.totalorder %s117_s28, %s189_s2 }
  0xc1   :  { %p123_p1 = pnand %p121_p0, %p118_p13 }
  0xc3   :  { %126 = shalt.err (!%p123_p1)
}
  0xc4   :  { %68 = dma.vmem_to_hbm [thread:$0]  %s63_s25, 256, %s189_s2, [#allocation4], %s132_s19, %s132_s19, %s133_s20  }
  0xc5   :  { %129 = dma.done.wait [#allocation4], 256  }
  0xc6   :  { %130 = vsyncadd [#allocation4], 4294967040 }
  0xc7   :  { %72 = vsyncpa [#allocation3], 1 }
  0xc8   :  { %73 = vsyncpa [#allocation4], 1 }

</bundles_post_ra>
